<compile_context>
chip_gen: v6e
topology: v6e:2x2x1
jax: 0.10.0
libtpu: 0.0.40
codegen_flags: <defaults>
</compile_context>

<pallas_src>
import functools

import jax
import jax.numpy as jnp
from jax.experimental import pallas as pl
from jax.experimental.pallas import tpu as pltpu


def _layernorm_f32(xf, a, b, eps):
    """Unbiased-std LayerNorm (matches torch.std + eps-on-std semantics)."""
    d = xf.shape[-1]
    mean = jnp.mean(xf, axis=-1, keepdims=True)
    diff = xf - mean
    var_unbiased = jnp.sum(diff * diff, axis=-1, keepdims=True) / max(d - 1, 1)
    std = jnp.sqrt(var_unbiased)
    inv = 1.0 / (std + eps)          # exact; kernel is MXU/HBM bound, not EUP bound
    return a * (diff * inv) + b


def _fused_kernel(x_ref, a_ref, b_ref, w_ref, wb_ref, o_ref, *, eps):
    """1-D row grid, full (D, D) weight resident (single-buffered)."""
    xf = x_ref[...].astype(jnp.float32)
    normed = _layernorm_f32(xf, a_ref[...], b_ref[...], eps)
    # sublayer = Linear(D, D): bf16 operands, f32 accumulation on the MXU.
    y = jnp.dot(normed.astype(jnp.bfloat16), w_ref[...],
                preferred_element_type=jnp.float32) + wb_ref[...]
    # dropout (eval mode -> identity) + residual; re-read the VMEM tile instead
    # of keeping an f32 copy of x live across the MXU section.
    o_ref[...] = (x_ref[...].astype(jnp.float32) + y).astype(o_ref.dtype)


def _fused_kernel_ntiled(x_ref, xr_ref, a_ref, b_ref, w_ref, wb_ref, o_ref,
                         normed_ref, *, eps):
    """2-D grid (rows, N): weight block (D, TN); LayerNorm computed once per row
    tile (j == 0) into a VMEM scratch and reused across the N axis."""
    @pl.when(pl.program_id(1) == 0)
    def _():
        xf = x_ref[...].astype(jnp.float32)
        normed_ref[...] = _layernorm_f32(
            xf, a_ref[...], b_ref[...], eps).astype(jnp.bfloat16)

    y = jnp.dot(normed_ref[...], w_ref[...],
                preferred_element_type=jnp.float32) + wb_ref[...]
    o_ref[...] = (xr_ref[...].astype(jnp.float32) + y).astype(o_ref.dtype)


def sublayer_connection(x, a_2, b_2, w, wb, *, eps=1e-6, row_tile=512, n_tile=None):
    """out = x + Linear(LayerNorm(x)); dropout = identity (eval mode).

    x: (B, S, D).  `w` should already be stored in bf16 (MXU-native) so no
    per-call cast is emitted; if given in another dtype it is cast here.
    """
    B, S, D = x.shape
    rows = B * S
    x2 = x.reshape(rows, D)

    a2 = a_2.reshape(1, D).astype(jnp.float32)
    b2 = b_2.reshape(1, D).astype(jnp.float32)
    wb2 = wb.reshape(1, D).astype(jnp.float32)
    if w.dtype != jnp.bfloat16:          # callers should pass bf16 to avoid this
        w = w.astype(jnp.bfloat16)

    # Generation-aware physical VMEM (v5e/v6e: 128 MiB, v7x: 64 MiB per TC).
    try:
        phys_vmem = int(pltpu.get_tpu_info().vmem_capacity_bytes)
    except Exception:  # conservative fallback = smallest current part (v7x)
        phys_vmem = 64 << 20

    itemsize = jnp.dtype(x.dtype).itemsize

    # Row tile: multiple of 8 (or full row count for small inputs). No wrapper
    # padding — the ragged last block is masked by Pallas.
    row_tile = max(8, (row_tile // 8) * 8)
    if rows <= row_tile:
        tile = rows
        grid_rows = 1
    else:
        tile = row_tile
        grid_rows = pl.cdiv(rows, tile)

    # Weight residency: keep the full (D, D) bf16 weight resident (single
    # buffered) unless it would eat more than ~1/3 of physical VMEM; then tile
    # the output-N dimension (v7x / D >= ~4096 territory).
    weight_bytes = D * D * 2
    if n_tile is None:
        if weight_bytes <= phys_vmem // 3:
            n_tile = D
        else:
            n_tile = D
            for cand in (1024, 512, 256, 128):
                if D % cand == 0:
                    n_tile = cand
                    break
    n_tile = min(n_tile, D)
    tiled_n = n_tile < D
    if tiled_n:
        assert D % n_tile == 0 and n_tile % 128 == 0, \
            "n_tile must divide D and be a multiple of 128"

    if tiled_n:
        needed = (2 * D * n_tile * 2              # weight blocks (double-buffered, bf16)
                  + 2 * tile * D * itemsize       # x (norm input)
                  + 2 * tile * n_tile * itemsize  # x residual columns
                  + 2 * tile * n_tile * itemsize  # output tile
                  + tile * D * 2                  # normed scratch (bf16)
                  + 3 * tile * D * 4)             # f32 temporaries headroom
    else:
        needed = (D * D * 2                       # weight (single-buffered, bf16)
                  + 2 * tile * D * itemsize       # x (double-buffered)
                  + 2 * tile * D * itemsize       # output (double-buffered)
                  + 4 * tile * D * 4)             # f32 temporaries headroom
    needed += 6 * D * 4                           # (1, D) params
    vmem_limit = int(min(max(needed + (8 << 20), 32 << 20), int(phys_vmem * 0.85)))

    cost = pl.CostEstimate(
        flops=2 * rows * D * D,
        transcendentals=2 * rows,                        # sqrt + reciprocal per row
        bytes_accessed=(2 * rows * D * itemsize          # x read + out write
                        + D * D * 2                      # bf16 weight
                        + 3 * D * 4),                    # a_2, b_2, linear bias
    )

    if not tiled_n:
        out = pl.pallas_call(
            functools.partial(_fused_kernel, eps=eps),
            out_shape=jax.ShapeDtypeStruct((rows, D), x.dtype),
            grid_spec=pltpu.PrefetchScalarGridSpec(
                num_scalar_prefetch=0,
                grid=(grid_rows,),
                in_specs=[
                    pl.BlockSpec((tile, D), lambda i: (i, 0)),      # x rows
                    pl.BlockSpec((1, D), lambda i: (0, 0)),         # a_2 (gain)
                    pl.BlockSpec((1, D), lambda i: (0, 0)),         # b_2 (bias)
                    # grid-invariant weight: single-buffered (halves VMEM use)
                    pl.BlockSpec((D, D), lambda i: (0, 0),
                                 pipeline_mode=pl.Buffered(1)),
                    pl.BlockSpec((1, D), lambda i: (0, 0)),         # linear bias
                ],
                out_specs=pl.BlockSpec((tile, D), lambda i: (i, 0)),
            ),
            compiler_params=pltpu.CompilerParams(
                dimension_semantics=("parallel",),
                vmem_limit_bytes=vmem_limit,
            ),
            cost_estimate=cost,
        )(x2, a2, b2, w, wb2)
    else:
        grid_n = D // n_tile
        out = pl.pallas_call(
            functools.partial(_fused_kernel_ntiled, eps=eps),
            out_shape=jax.ShapeDtypeStruct((rows, D), x.dtype),
            grid_spec=pltpu.PrefetchScalarGridSpec(
                num_scalar_prefetch=0,
                grid=(grid_rows, grid_n),
                in_specs=[
                    # full-width x for the norm; block index constant in j, so
                    # the DMA is not repeated across the N axis.
                    pl.BlockSpec((tile, D), lambda i, j: (i, 0)),
                    # column slice of x for the residual of this output tile.
                    pl.BlockSpec((tile, n_tile), lambda i, j: (i, j)),
                    pl.BlockSpec((1, D), lambda i, j: (0, 0)),       # a_2
                    pl.BlockSpec((1, D), lambda i, j: (0, 0)),       # b_2
                    pl.BlockSpec((D, n_tile), lambda i, j: (0, j)),  # weight cols
                    pl.BlockSpec((1, n_tile), lambda i, j: (0, j)),  # bias cols
                ],
                out_specs=pl.BlockSpec((tile, n_tile), lambda i, j: (i, j)),
                scratch_shapes=[pltpu.VMEM((tile, D), jnp.bfloat16)],
            ),
            compiler_params=pltpu.CompilerParams(
                dimension_semantics=("parallel", "arbitrary"),
                vmem_limit_bytes=vmem_limit,
            ),
            cost_estimate=cost,
        )(x2, x2, a2, b2, w, wb2)

    return out.reshape(B, S, D)


def _reference(x, a_2, b_2, w, wb, eps=1e-6):
    xf = x.astype(jnp.float32)
    mean = jnp.mean(xf, axis=-1, keepdims=True)
    diff = xf - mean
    var = jnp.sum(diff * diff, axis=-1, keepdims=True) / (xf.shape[-1] - 1)
    std = jnp.sqrt(var)
    normed = a_2 * diff / (std + eps) + b_2
    y = normed @ w.astype(jnp.float32) + wb
    return (xf + y).astype(x.dtype)


if __name__ == "__main__":
    key = jax.random.PRNGKey(0)
    kx, kw, kb, kx2, kw2, kb2 = jax.random.split(key, 6)

    # --- primary test: small shape, full-weight (resident, single-buffered) path ---
    B, S, D = 2, 8, 32
    x = jax.random.normal(kx, (B, S, D), dtype=jnp.float32)
    a_2 = jnp.ones((D,), dtype=jnp.float32)      # LayerNorm init: ones / zeros
    b_2 = jnp.zeros((D,), dtype=jnp.float32)
    # Linear weight stored directly in bf16 (MXU-native) -> no per-call cast.
    w = (jax.random.normal(kw, (D, D), dtype=jnp.float32) / jnp.sqrt(D)).astype(jnp.bfloat16)
    wb = jax.random.normal(kb, (D,), dtype=jnp.float32) * 0.01

    out = jax.block_until_ready(sublayer_connection(x, a_2, b_2, w, wb))
    ref = _reference(x, a_2, b_2, w, wb)
    assert out.shape == (B, S, D)
    assert jnp.allclose(out, ref, atol=2e-2, rtol=2e-2), "mismatch (full-weight path)"

    # --- secondary test: force the output-N-tiled path (large-D / v7x layout) ---
    D2 = 256
    x_b = jax.random.normal(kx2, (B, S, D2), dtype=jnp.float32)
    a_2b = jnp.ones((D2,), dtype=jnp.float32)
    b_2b = jnp.zeros((D2,), dtype=jnp.float32)
    w_b = (jax.random.normal(kw2, (D2, D2), dtype=jnp.float32) / jnp.sqrt(D2)).astype(jnp.bfloat16)
    wb_b = jax.random.normal(kb2, (D2,), dtype=jnp.float32) * 0.01

    out_b = jax.block_until_ready(
        sublayer_connection(x_b, a_2b, b_2b, w_b, wb_b, n_tile=128))
    ref_b = _reference(x_b, a_2b, b_2b, w_b, wb_b)
    assert out_b.shape == (B, S, D2)
    assert jnp.allclose(out_b, ref_b, atol=2e-2, rtol=2e-2), "mismatch (N-tiled path)"

    print("KERNEL_OK")
</pallas_src>

<mosaic_0001>
module attributes {stable_mosaic.version = 11 : i64} {
  func.func @_fused_kernel(%arg0: i32, %arg1: memref<16x32xf32, #tpu.memory_space<vmem>>, %arg2: memref<1x32xf32, #tpu.memory_space<vmem>>, %arg3: memref<1x32xf32, #tpu.memory_space<vmem>>, %arg4: memref<32x32xbf16, #tpu.memory_space<vmem>>, %arg5: memref<1x32xf32, #tpu.memory_space<vmem>>, %arg6: memref<16x32xf32, #tpu.memory_space<vmem>>) attributes {dimension_semantics = [#tpu.dimension_semantics<parallel>], iteration_bounds = array<i64: 1>, scalar_prefetch = 0 : i64, scratch_operands = 0 : i64, tpu.core_type = #tpu.core_type<tc>, window_params = [{transform_indices = @transform_0, window_bounds = array<i64: 16, 32>}, {pipeline_mode = #tpu.pipeline_mode<synchronous>, transform_indices = @transform_1, window_bounds = array<i64: 1, 32>}, {pipeline_mode = #tpu.pipeline_mode<synchronous>, transform_indices = @transform_2, window_bounds = array<i64: 1, 32>}, {pipeline_mode = #tpu.pipeline_mode<synchronous>, transform_indices = @transform_3, window_bounds = array<i64: 32, 32>}, {pipeline_mode = #tpu.pipeline_mode<synchronous>, transform_indices = @transform_4, window_bounds = array<i64: 1, 32>}, {transform_indices = @transform_5, window_bounds = array<i64: 16, 32>}]} {
    %c0 = arith.constant 0 : index
    %c0_0 = arith.constant 0 : index
    %0 = vector.load %arg1[%c0, %c0_0] : memref<16x32xf32, #tpu.memory_space<vmem>>, vector<16x32xf32>
    %c0_1 = arith.constant 0 : index
    %c0_2 = arith.constant 0 : index
    %1 = vector.load %arg2[%c0_1, %c0_2] : memref<1x32xf32, #tpu.memory_space<vmem>>, vector<1x32xf32>
    %c0_3 = arith.constant 0 : index
    %c0_4 = arith.constant 0 : index
    %2 = vector.load %arg3[%c0_3, %c0_4] : memref<1x32xf32, #tpu.memory_space<vmem>>, vector<1x32xf32>
    %cst = arith.constant dense<0.000000e+00> : vector<16xf32>
    %3 = vector.multi_reduction <add>, %0, %cst [1] : vector<16x32xf32> to vector<16xf32>
    %4 = vector.shape_cast %3 : vector<16xf32> to vector<16x1xf32>
    %cst_5 = arith.constant 3.200000e+01 : f32
    %5 = vector.broadcast %cst_5 : f32 to vector<16x1xf32>
    %6 = arith.divf %4, %5 : vector<16x1xf32>
    %7 = vector.broadcast %6 : vector<16x1xf32> to vector<16x32xf32>
    %8 = arith.subf %0, %7 : vector<16x32xf32>
    %9 = arith.mulf %8, %8 : vector<16x32xf32>
    %cst_6 = arith.constant dense<0.000000e+00> : vector<16xf32>
    %10 = vector.multi_reduction <add>, %9, %cst_6 [1] : vector<16x32xf32> to vector<16xf32>
    %11 = vector.shape_cast %10 : vector<16xf32> to vector<16x1xf32>
    %cst_7 = arith.constant 3.100000e+01 : f32
    %12 = vector.broadcast %cst_7 : f32 to vector<16x1xf32>
    %13 = arith.divf %11, %12 : vector<16x1xf32>
    %14 = math.sqrt %13 : vector<16x1xf32>
    %cst_8 = arith.constant 9.99999997E-7 : f32
    %15 = vector.broadcast %cst_8 : f32 to vector<16x1xf32>
    %16 = arith.addf %14, %15 : vector<16x1xf32>
    %cst_9 = arith.constant 1.000000e+00 : f32
    %17 = vector.broadcast %cst_9 : f32 to vector<16x1xf32>
    %18 = arith.divf %17, %16 : vector<16x1xf32>
    %19 = vector.broadcast %18 : vector<16x1xf32> to vector<16x32xf32>
    %20 = arith.mulf %8, %19 : vector<16x32xf32>
    %21 = vector.broadcast %1 : vector<1x32xf32> to vector<16x32xf32>
    %22 = arith.mulf %21, %20 : vector<16x32xf32>
    %23 = vector.broadcast %2 : vector<1x32xf32> to vector<16x32xf32>
    %24 = arith.addf %22, %23 : vector<16x32xf32>
    %25 = arith.truncf %24 : vector<16x32xf32> to vector<16x32xbf16>
    %c0_10 = arith.constant 0 : index
    %c0_11 = arith.constant 0 : index
    %26 = vector.load %arg4[%c0_10, %c0_11] : memref<32x32xbf16, #tpu.memory_space<vmem>>, vector<32x32xbf16>
    %cst_12 = arith.constant dense<0.000000e+00> : vector<16x32xf32>
    %27 = tpu.matmul %25, %26, %cst_12 {dimension_numbers = #tpu.dot_dimension_numbers<[1], [0], [0], [1], [0, 0, 1, 1], [], []>} : vector<16x32xbf16>, vector<32x32xbf16>, vector<16x32xf32> -> vector<16x32xf32>
    %c0_13 = arith.constant 0 : index
    %c0_14 = arith.constant 0 : index
    %28 = vector.load %arg5[%c0_13, %c0_14] : memref<1x32xf32, #tpu.memory_space<vmem>>, vector<1x32xf32>
    %29 = vector.broadcast %28 : vector<1x32xf32> to vector<16x32xf32>
    %30 = arith.addf %27, %29 : vector<16x32xf32>
    %c0_15 = arith.constant 0 : index
    %c0_16 = arith.constant 0 : index
    %31 = vector.load %arg1[%c0_15, %c0_16] : memref<16x32xf32, #tpu.memory_space<vmem>>, vector<16x32xf32>
    %32 = arith.addf %31, %30 : vector<16x32xf32>
    %c0_17 = arith.constant 0 : index
    %c0_18 = arith.constant 0 : index
    %33 = vector.load %arg6[%c0_17, %c0_18] : memref<16x32xf32, #tpu.memory_space<vmem>>, vector<16x32xf32>
    tpu.vector_store %arg6[%c0_17, %c0_18], %32 {strides = array<i32>} : memref<16x32xf32, #tpu.memory_space<vmem>>, vector<16x32xf32>,
    return
  }
  func.func @transform_0(%arg0: i32) -> (i32, i32) {
    %c0_i32 = arith.constant 0 : i32
    %c0_i32_0 = arith.constant 0 : i32
    return %arg0, %c0_i32 : i32, i32
  }
  func.func @transform_1(%arg0: i32) -> (i32, i32) {
    %c0_i32 = arith.constant 0 : i32
    %c0_i32_0 = arith.constant 0 : i32
    %c0_i32_1 = arith.constant 0 : i32
    return %c0_i32, %c0_i32_0 : i32, i32
  }
  func.func @transform_2(%arg0: i32) -> (i32, i32) {
    %c0_i32 = arith.constant 0 : i32
    %c0_i32_0 = arith.constant 0 : i32
    %c0_i32_1 = arith.constant 0 : i32
    return %c0_i32, %c0_i32_0 : i32, i32
  }
  func.func @transform_3(%arg0: i32) -> (i32, i32) {
    %c0_i32 = arith.constant 0 : i32
    %c0_i32_0 = arith.constant 0 : i32
    %c0_i32_1 = arith.constant 0 : i32
    return %c0_i32, %c0_i32_0 : i32, i32
  }
  func.func @transform_4(%arg0: i32) -> (i32, i32) {
    %c0_i32 = arith.constant 0 : i32
    %c0_i32_0 = arith.constant 0 : i32
    %c0_i32_1 = arith.constant 0 : i32
    return %c0_i32, %c0_i32_0 : i32, i32
  }
  func.func @transform_5(%arg0: i32) -> (i32, i32) {
    %c0_i32 = arith.constant 0 : i32
    %c0_i32_0 = arith.constant 0 : i32
    return %arg0, %c0_i32 : i32, i32
  }
}

</mosaic_0001>

<bundles_post_ra>
// kernel: tpu_custom_call.1
= control target key start
LH: loop header
LB: loop body
LE: loop exit
PB: predicated region body
PF: predicated region fallthrough
CT: control target
= control target key end

     0   :  { %10 = vsyncpa [#allocation3], 0  ;;  %s387_s0 = inlined_call_operand.hbm [shape: f32[16,32], index: 0, kind: input, shape index: {}]   ;;  %s388_s1 = inlined_call_operand.vmem [shape: f32[1,32], index: 1, kind: input, shape index: {}]   ;;  %s389_s2 = inlined_call_operand.vmem [shape: f32[1,32], index: 2, kind: input, shape index: {}]   ;;  %s390_s3 = inlined_call_operand.hbm [shape: bf16[32,32], index: 3, kind: input, shape index: {}]   ;;  %s391_s4 = inlined_call_operand.vmem [shape: f32[1,32], index: 4, kind: input, shape index: {}]   ;;  %s392_s5 = inlined_call_operand.hbm [shape: f32[16,32], index: 5, kind: output, shape index: {}]  }
   0x1   :  { %11 = vsyncpa [#allocation6], 0 }
   0x2   :  { %12 = vsyncpa [#allocation4], 0  ;;  %s307_s18 = smov [#allocation2]  }
   0x3   :  { %s18_s19 = sshll.u32 %s307_s18, 4  ;;  %s19_s19 = int_to_ptr.vmem [resolvable:$true] %s18_s19 }
   0x4   :  { %s249_s20 = scalar_lea.vmem %s19_s19, 256  ;;  %p254_p1 = scmp.lt.s32.totalorder %s19_s19, %s19_s19 }
   0x5   :  { %p250_p0 = scmp.ne.s32.totalorder %s19_s19, %s249_s20  ;;  %p255_p2 = scmp.lt.s32.totalorder %s249_s20, %s249_s20 }
   0x7   :  { %p256_p3 = por %p255_p2, %p254_p1 }
   0x9   :  { %p257_p4 = pnand %p256_p3, %p250_p0 }
   0xb   :  { %260 = shalt.err (!%p257_p4)
}
   0xc   :  { %s308_s21 = smov 128   ;;  %s309_s22 = smov 8  }
   0xd   :  { %24 = dma.hbm_to_vmem [thread:$0]  %s387_s0, 256, %s19_s19, [#allocation3], %s308_s21, %s308_s21, %s309_s22  }
   0xe   :  { %s310_s25 = smov [#allocation5]  }
   0xf   :  { %s34_s26 = sshll.u32 %s310_s25, 4  ;;  %s35_s26 = int_to_ptr.vmem [resolvable:$true] %s34_s26 }
  0x10   :  { %s269_s27 = scalar_lea.vmem %s35_s26, 256  ;;  %p274_p6 = scmp.lt.s32.totalorder %s35_s26, %s35_s26 }
  0x11   :  { %p270_p5 = scmp.ne.s32.totalorder %s35_s26, %s269_s27  ;;  %p275_p7 = scmp.lt.s32.totalorder %s269_s27, %s269_s27 }
  0x13   :  { %p276_p8 = por %p275_p7, %p274_p6 }
  0x15   :  { %p277_p9 = pnand %p276_p8, %p270_p5 }
  0x17   :  { %280 = shalt.err (!%p277_p9)
}
  0x18   :  { %s311_s28 = smov 64   ;;  %s312_s29 = smov 4  }
  0x19   :  { %40 = dma.hbm_to_vmem [thread:$0]  %s390_s3, 256, %s35_s26, [#allocation6], %s311_s28, %s311_s28, %s312_s29  }
  0x1a   :  { %301 = dma.done.wait [#allocation3], 256  }
  0x1b   :  { %302 = vsyncadd [#allocation3], 4294967040 }
  0x1c   :  { %303 = dma.done.wait [#allocation6], 256  }
  0x1d   :  { %304 = vsyncadd [#allocation6], 4294967040  ;;  %vm54_vm0 = vcmask 261120   ;;  %v355_v0 = vld [vmem:[#allocation2] sm:$0xff]  ;;  %v357_v1 = vld [vmem:[#allocation2 + $0x8] sm:$0xff]  ;;  %v313_v15 = vmov 0.0  }
  0x1e   :  { %v55_v2 = vsel %vm54_vm0, %v355_v0, 0.0  ;;  %v58_v3 = vsel %vm54_vm0, %v357_v1, 0.0  ;;  %v231_v14 = vld [vmem:[#allocation5 + $0x8] sm:$0xff]   ;;  %214 = vmatprep.subr.bf16.mxu0 %v313_v15  ;;  %vm314_vm1 = vmmov 0   ;;  %v232_v16 = vld [vmem:[#allocation5] sm:$0xff]  }
  0x1f   :  { %56 = vadd.xlane.f32.xlu0 %v55_v2  ;;  %218 = vmatprep.mubr.msk.bf16.mxu0 %vm314_vm1, %v313_v15  ;;  %v205_v35 = vld [vmem:[%s388_s1] ss:$0 sm:$0xff]  ;;  %s315_s1 = smov [#allocation7]  }
  0x20   :  { %215 = vmatpush3.bf16.msra.mxu0 %v231_v14  ;;  %v206_v39 = vld [vmem:[%s389_s2] ss:$0 sm:$0xff]  ;;  %s192_s11 = sshll.u32 %s315_s1, 4  ;;  %s193_s11 = int_to_ptr.vmem [resolvable:$true] %s192_s11 }
  0x21   :  { %216 = vmatprep.subr.bf16.mxu0 %v313_v15  ;;  %v207_v44 = vld [vmem:[%s391_s4] ss:$0 sm:$0xff]  ;;  %s281_s2 = scalar_lea.vmem %s193_s11, 256  ;;  %p286_p11 = scmp.lt.s32.totalorder %s193_s11, %s193_s11 }
  0x22   :  { %p282_p10 = scmp.ne.s32.totalorder %s193_s11, %s281_s2  ;;  %p287_p12 = scmp.lt.s32.totalorder %s281_s2, %s281_s2 }
  0x23   :  { %59 = vadd.xlane.f32.xlu0 %v58_v3 }
  0x24   :  { %217 = vmatpush3.bf16.msra.mxu0 %v232_v16  ;;  %p288_p13 = por %p287_p12, %p286_p11 }
  0x26   :  { %p289_p0 = pnand %p288_p13, %p282_p10 }
  0xa8   :  { %v57_v4 = vpop.xlane.xlu0 %56 }
  0xa9   :  { %v62_v5 = vmul.f32 0.03125, %v57_v4 }
  0xab   :  { %v64_v6 = vsub.f32 %v355_v0, %v62_v5 }
  0xac   :  { %v60_v7 = vpop.xlane.xlu0 %59 }
  0xad   :  { %v63_v8 = vmul.f32 0.03125, %v60_v7  ;;  %v66_v9 = vmul.f32 %v64_v6, %v64_v6 }
  0xaf   :  { %v65_v10 = vsub.f32 %v357_v1, %v63_v8  ;;  %v68_v11 = vsel %vm54_vm0, %v66_v9, 0.0 }
  0xb0   :  { %69 = vadd.xlane.f32.xlu1 %v68_v11 }
  0xb1   :  { %v67_v12 = vmul.f32 %v65_v10, %v65_v10 }
  0xb3   :  { %v71_v13 = vsel %vm54_vm0, %v67_v12, 0.0 }
  0xb4   :  { %72 = vadd.xlane.f32.xlu1 %v71_v13 }
 0x139   :  { %v70_v17 = vpop.xlane.xlu1 %69 }
 0x13a   :  { %v75_v18 = vmul.f32 0.032258064, %v70_v17 }
 0x13c   :  { %233 = vrsqrt.f32 %v75_v18  ;;  %vm79_vm2 = vcmp.eq.f32.partialorder %v75_v18, inf  ;;  %v82_v23 = vand.u32 2147483648, %v75_v18  ;;  %vm81_vm3 = vcmp.eq.f32.partialorder %v75_v18, 0.0 }
 0x13d   :  { %v73_v19 = vpop.xlane.xlu1 %72 }
 0x13e   :  { %v76_v20 = vmul.f32 0.032258064, %v73_v19 }
 0x140   :  { %235 = vrsqrt.f32 %v76_v20  ;;  %vm86_vm4 = vcmp.eq.f32.partialorder %v76_v20, inf  ;;  %v89_v29 = vand.u32 2147483648, %v76_v20  ;;  %vm88_vm5 = vcmp.eq.f32.partialorder %v76_v20, 0.0 }
 0x149   :  { %v234_v21 = vpop.eup %233 }
 0x14a   :  { %v78_v22 = vmul.f32 %v234_v21, %v75_v18 }
 0x14c   :  { %v80_v24 = vsel %vm79_vm2, %v75_v18, %v78_v22 }
 0x14d   :  { %v236_v25 = vpop.eup %235  ;;  %v83_v26 = vsel %vm81_vm3, %v82_v23, %v80_v24 }
 0x14e   :  { %v91_v27 = vadd.f32 1e-06, %v83_v26  ;;  %v85_v28 = vmul.f32 %v236_v25, %v76_v20 }
 0x150   :  { %237 = vrcp.f32 %v91_v27  ;;  %v87_v30 = vsel %vm86_vm4, %v76_v20, %v85_v28 }
 0x151   :  { %v90_v31 = vsel %vm88_vm5, %v89_v29, %v87_v30 }
 0x152   :  { %v92_v32 = vadd.f32 1e-06, %v90_v31 }
 0x154   :  { %239 = vrcp.f32 %v92_v32 }
 0x15d   :  { %v238_v33 = vpop.eup %237 }
 0x15e   :  { %v97_v34 = vmul.f32 %v238_v33, %v64_v6 }
 0x160   :  { %v105_v38 = vmul.f32 %v205_v35, %v97_v34 }
 0x161   :  { %v240_v36 = vpop.eup %239 }
 0x162   :  { %v98_v37 = vmul.f32 %v240_v36, %v65_v10  ;;  %v113_v41 = vadd.f32 %v206_v39, %v105_v38 }
 0x164   :  { %v106_v40 = vmul.f32 %v205_v35, %v98_v37 }
 0x166   :  { %v114_v42 = vadd.f32 %v206_v39, %v106_v40 }
 0x168   :  { %v115_v43 = vpack.c.bf16 %v114_v42, %v113_v41 }
 0x16a   :  { %219 = vmatmul.mubr.msk.bf16.vlgmr.msra.gmra.mxu0 %vm54_vm0, %v115_v43 }
 0x22a   :  { %v176_v45 = vpop.f32.mrf.mxu0 }
 0x22b   :  { %v177_v46 = vadd.f32 %v207_v44, %v176_v45 }
 0x22c   :  { %v220_v47 = vpop.f32.mrf.mxu0 }
 0x22d   :  { %v183_v48 = vadd.f32 %v177_v46, %v355_v0 }
 0x22e   :  { %v179_v49 = vpop.f32.mrf.mxu0 }
 0x22f   :  { %185 = vst.msk [vmem:[#allocation7] sm:$0xff] %vm54_vm0, %v183_v48  ;;  %v180_v50 = vadd.f32 %v207_v44, %v179_v49 }
 0x230   :  { %v221_v51 = vpop.f32.mrf.mxu0 }
 0x231   :  { %v184_v52 = vadd.f32 %v180_v50, %v357_v1 }
 0x233   :  { %186 = vst.msk [vmem:[#allocation7 + $0x8] sm:$0xff] %vm54_vm0, %v184_v52 }
 0x234   :  { %292 = shalt.err (!%p289_p0)
}
 0x235   :  { %198 = dma.vmem_to_hbm [thread:$0]  %s193_s11, 256, %s392_s5, [#allocation4], %s308_s21, %s308_s21, %s309_s22  }
 0x236   :  { %305 = dma.done.wait [#allocation4], 256  }
 0x237   :  { %306 = vsyncadd [#allocation4], 4294967040 }
 0x238   :  { %202 = vsyncpa [#allocation3], 1 }
 0x239   :  { %203 = vsyncpa [#allocation6], 1 }
 0x23a   :  { %204 = vsyncpa [#allocation4], 1 }

</bundles_post_ra>
